<compile_context>
chip_gen: v7x
topology: tpu7x:2x2x1
jax: 0.10.0
libtpu: 0.0.40
codegen_flags: <defaults>
</compile_context>

<pallas_src>
import functools

import jax
import jax.numpy as jnp
import numpy as np
from jax import lax
from jax.experimental import pallas as pl
from jax.experimental.pallas import tpu as pltpu


EDGE_TILE = 512  # edges per grid step (lane tile); sweep 256/512/1024 on real workloads


def _lap_kernel(maps_ref, scal_ref, ids_ref, t_ref, diag_ref, *, d, md, n_p):
    """One grid step = one `edge_tile`-edge tile.

    maps_ref: (2*md*d, ET) f32. rows [0, md*d): maps_from (row a*d+dd = maps[e, dd, a]),
                                rows [md*d, 2*md*d): maps_to, same layout.
    scal_ref: (8, ET) f32.  row 0: dinv[row]*dinv[col]; row 1: dinv[from_node]^2;
                            row 2: dinv[to_node]^2; rows 3..7 unused.
    ids_ref:  (2*ET, 1) int32. rows [0, ET): node of each 'from' half-edge,
                               rows [ET, 2*ET): node of each 'to' half-edge (pad = n_p).
    t_ref:    (2*md*md, ET) f32 out. rows [0, md*md): norm*(from^T to) (row a*md+b),
                                     rows [md*md, 2*md*md): norm*(to^T from).
    diag_ref: (md*md, n_p) f32 out, accumulated in place across the inner grid axis.
    """
    i = pl.program_id(1)

    @pl.when(i == 0)
    def _init():
        diag_ref[...] = jnp.zeros_like(diag_ref)

    m = maps_ref[...]                       # (2*md*d, ET)
    scal = scal_ref[...]                    # (8, ET)
    norm = scal[0:1, :]
    dscf = scal[1:2, :]
    dsct = scal[2:3, :]

    f = m[:md * d, :]                       # (md*d, ET)
    t = m[md * d:, :]

    tf_rows, ttf_rows, gf_rows, gt_rows = [], [], [], []
    for a in range(md):
        fa = f[a * d:(a + 1) * d, :]        # contiguous sublane slices
        ta = t[a * d:(a + 1) * d, :]
        for b in range(md):
            fb = f[b * d:(b + 1) * d, :]
            tb = t[b * d:(b + 1) * d, :]
            tf_rows.append(jnp.sum(fa * tb, axis=0, keepdims=True))   # (from^T to)[a,b]
            ttf_rows.append(jnp.sum(ta * fb, axis=0, keepdims=True))  # (to^T from)[a,b]
            gf_rows.append(jnp.sum(fa * fb, axis=0, keepdims=True))   # (from^T from)[a,b]
            gt_rows.append(jnp.sum(ta * tb, axis=0, keepdims=True))   # (to^T to)[a,b]

    # TODO(synk): the 1-sublane concats scale as md^2 (XLU work); negligible at md=2.
    tf = jnp.concatenate(tf_rows, axis=0) * norm        # (md*md, ET)
    ttf = jnp.concatenate(ttf_rows, axis=0) * norm
    gf = jnp.concatenate(gf_rows, axis=0) * dscf
    gt = jnp.concatenate(gt_rows, axis=0) * dsct

    # packed off-diagonal output: 2*md*md sublanes (= 8 for md=2) -> unmasked stores
    t_ref[...] = jnp.concatenate([tf, ttf], axis=0)

    # diagonal segment-sum: build the one-hot selection matrix in-kernel (no HBM
    # stream) and issue ONE fused MXU matmul with K = 2*ET.
    ids = ids_ref[...]                                                # (2*ET, 1)
    onehot = (lax.broadcasted_iota(jnp.int32, (ids.shape[0], n_p), 1) == ids
              ).astype(jnp.float32)                                   # (2*ET, n_p)
    g_cat = jnp.concatenate([gf, gt], axis=1)                         # (md*md, 2*ET)
    diag_ref[...] += jnp.dot(g_cat, onehot, preferred_element_type=jnp.float32)


def laplacian_builder(adj_mat, degrees, maps, edge_index, edge_tile=EDGE_TILE):
    """Pallas implementation of LaplacianBuilder.forward."""
    two_e, d, md = maps.shape
    E = two_e // 2
    N = adj_mat.shape[0]
    f32 = jnp.float32

    # ---- glue: masks / scatter indices (row-major nonzero order, as torch bool-mask assign) ----
    # NOTE: assumes exactly 2E off-diagonal nonzeros (E upper + E lower); jnp.nonzero(size=...)
    # would silently pad with index 0 otherwise.
    offdiag = ((adj_mat > 0) & (~jnp.eye(N, dtype=bool))).astype(jnp.int32)
    ul_r, _ul_c = jnp.nonzero(offdiag, size=2 * E)               # all off-diag positions
    tu_r, tu_c = jnp.nonzero(jnp.triu(offdiag, 1), size=E)       # strict upper
    tl_r, tl_c = jnp.nonzero(jnp.tril(offdiag, -1), size=E)      # strict lower

    dinsq = (degrees.astype(f32) * d + 1.0) ** -0.5              # (N,)
    row, col = edge_index[0, :E], edge_index[1, :E]

    # ---- tiling ----
    edge_tile = min(edge_tile, max(128, -(-E // 128) * 128))     # don't over-pad tiny graphs
    n_tiles = -(-E // edge_tile)
    EP = n_tiles * edge_tile
    Np = max(128, -(-N // 128) * 128)
    n_outer = 2 if (n_tiles >= 2 and n_tiles % 2 == 0) else 1    # megacore split (v7x)
    n_inner = n_tiles // n_outer

    # ---- packed per-edge operands ----
    maps_f = maps.astype(f32)
    # (E, d, md) -> (md, d, E) -> (md*d, E): row a*d+dd holds maps[e, dd, a], edge on lanes
    from2d = jnp.transpose(maps_f[:E], (2, 1, 0)).reshape(md * d, E)
    to2d = jnp.transpose(maps_f[E:], (2, 1, 0)).reshape(md * d, E)
    maps2d = jnp.zeros((2 * md * d, EP), f32)
    maps2d = maps2d.at[:md * d, :E].set(from2d).at[md * d:, :E].set(to2d)

    scal = jnp.zeros((8, EP), f32)
    scal = scal.at[0, :E].set(dinsq[row] * dinsq[col])
    scal = scal.at[1, :E].set(dinsq[ul_r[:E]] ** 2)
    scal = scal.at[2, :E].set(dinsq[ul_r[E:]] ** 2)

    # per-half-edge node ids, tile-stacked: rows [k*2ET, k*2ET+ET) = 'from' ids of tile k,
    # rows [k*2ET+ET, (k+1)*2ET) = 'to' ids; padding uses the out-of-range id Np.
    pad_id = jnp.int32(Np)
    idf = jnp.full((EP,), pad_id, jnp.int32).at[:E].set(ul_r[:E].astype(jnp.int32))
    idt = jnp.full((EP,), pad_id, jnp.int32).at[:E].set(ul_r[E:].astype(jnp.int32))
    ids2d = jnp.stack(
        [idf.reshape(n_tiles, edge_tile), idt.reshape(n_tiles, edge_tile)], axis=1
    ).reshape(2 * EP, 1)

    kernel = functools.partial(_lap_kernel, d=d, md=md, n_p=Np)
    t_out, diag_out = pl.pallas_call(
        kernel,
        out_shape=(
            jax.ShapeDtypeStruct((2 * md * md, EP), f32),
            jax.ShapeDtypeStruct((n_outer, md * md, Np), f32),
        ),
        grid_spec=pltpu.PrefetchScalarGridSpec(
            num_scalar_prefetch=0,
            grid=(n_outer, n_inner),
            in_specs=[
                pl.BlockSpec((2 * md * d, edge_tile),
                             lambda o, i: (0, o * n_inner + i)),
                pl.BlockSpec((8, edge_tile),
                             lambda o, i: (0, o * n_inner + i)),
                pl.BlockSpec((2 * edge_tile, 1),
                             lambda o, i: (o * n_inner + i, 0)),
            ],
            out_specs=[
                pl.BlockSpec((2 * md * md, edge_tile),
                             lambda o, i: (0, o * n_inner + i)),
                # constant inner index -> output block is the VMEM-resident accumulator
                pl.BlockSpec((None, md * md, Np), lambda o, i: (o, 0, 0)),
            ],
        ),
        compiler_params=pltpu.CompilerParams(
            # outer axis parallel (both TCs on v7x), inner axis is the diag reduction
            dimension_semantics=("parallel", "arbitrary")),
        # VMEM footprint is small (<2 MiB/step at these sizes); set vmem_limit_bytes
        # explicitly only for very large Np.
    )(maps2d, scal, ids2d)

    # ---- glue: scatter the compressed columns into the dense block Laplacian ----
    T = t_out[:md * md, :E].T.reshape(E, md, md)          # normalized (from^T to)
    Tt = t_out[md * md:, :E].T.reshape(E, md, md)         # its per-edge transpose
    D = diag_out.sum(axis=0)[:, :N].T.reshape(N, md, md)  # per-node diagonal blocks

    L = jnp.zeros((N, N, md, md), f32)
    L = L.at[tu_r, tu_c].set(-T)
    L = L.at[tl_r, tl_c].set(-Tt)
    L = L.at[jnp.arange(N), jnp.arange(N)].set(D)
    return jnp.transpose(L, (0, 2, 1, 3)).reshape(N * md, N * md)


def laplacian_ref(adj_mat, degrees, maps, edge_index):
    """Pure-JAX replica of the PyTorch forward (for correctness check)."""
    two_e, d, md = maps.shape
    E = two_e // 2
    N = adj_mat.shape[0]
    offdiag = ((adj_mat > 0) & (~jnp.eye(N, dtype=bool))).astype(jnp.int32)
    ul_r, ul_c = jnp.nonzero(offdiag, size=2 * E)
    tu_r, tu_c = jnp.nonzero(jnp.triu(offdiag, 1), size=E)
    tl_r, tl_c = jnp.nonzero(jnp.tril(offdiag, -1), size=E)

    G = jnp.einsum('kda,kdb->kab', maps, maps)                      # (2E, md, md)
    adj_maps = jnp.zeros((N, N, md, md), jnp.float32).at[ul_r, ul_c].set(G)
    maps_diag = adj_maps.sum(axis=1)                                # (N, md, md)

    mfrom, mto = maps[:E], maps[E:]
    T = jnp.einsum('eda,edb->eab', mfrom, mto)                      # (E, md, md)
    dinsq = (degrees.astype(jnp.float32) * d + 1.0) ** -0.5
    row, col = edge_index[0, :E], edge_index[1, :E]
    T = dinsq[row][:, None, None] * T * dinsq[col][:, None, None]
    maps_diag = (dinsq[:, None, None] ** 2) * maps_diag

    L = jnp.zeros((N, N, md, md), jnp.float32)
    L = L.at[tu_r, tu_c].set(-T)
    L = L.at[tl_r, tl_c].set(-jnp.transpose(T, (0, 2, 1)))
    L = L.at[jnp.arange(N), jnp.arange(N)].set(maps_diag)
    return jnp.transpose(L, (0, 2, 1, 3)).reshape(N * md, N * md)


if __name__ == "__main__":
    N = 8      # num_nodes
    d = 3      # stalk / map input dim
    md = 2     # maps_dim

    # symmetric adjacency: ring + 4 chords -> E = 12 undirected edges
    edges = [(0, 1), (1, 2), (2, 3), (3, 4), (4, 5), (5, 6), (6, 7), (0, 7),
             (0, 4), (1, 5), (2, 6), (3, 7)]
    E = len(edges)
    adj_np = np.zeros((N, N), dtype=np.float32)
    for u, v in edges:
        adj_np[u, v] = 1.0
        adj_np[v, u] = 1.0
    adj_mat = jnp.asarray(adj_np)
    degrees = jnp.asarray(adj_np.sum(axis=1))

    # edge_index: first E columns = upper-triangular edges in row-major order,
    # last E columns = reversed edges (standard convention for this builder).
    up = np.array(sorted(edges), dtype=np.int32)
    edge_index = jnp.asarray(np.stack([
        np.concatenate([up[:, 0], up[:, 1]]),
        np.concatenate([up[:, 1], up[:, 0]]),
    ]).astype(np.int32))

    key = jax.random.PRNGKey(0)
    maps = jax.random.normal(key, (2 * E, d, md), dtype=jnp.float32)

    L = laplacian_builder(adj_mat, degrees, maps, edge_index)
    L = jax.block_until_ready(L)

    L_ref = laplacian_ref(adj_mat, degrees, maps, edge_index)
    assert L.shape == (N * md, N * md)
    if not np.allclose(np.asarray(L), np.asarray(L_ref), atol=1e-4, rtol=1e-4):
        raise AssertionError("Pallas kernel output mismatch vs reference")
    print("KERNEL_OK")
</pallas_src>

<mosaic_0001>
module attributes {stable_mosaic.version = 11 : i64} {
  func.func @_lap_kernel(%arg0: i32, %arg1: i32, %arg2: memref<12x128xf32, #tpu.memory_space<vmem>>, %arg3: memref<8x128xf32, #tpu.memory_space<vmem>>, %arg4: memref<256x1xi32, #tpu.memory_space<vmem>>, %arg5: memref<8x128xf32, #tpu.memory_space<vmem>>, %arg6: memref<1x4x128xf32, #tpu.memory_space<vmem>>) attributes {dimension_semantics = [#tpu.dimension_semantics<parallel>, #tpu.dimension_semantics<arbitrary>], iteration_bounds = array<i64: 1, 1>, scalar_prefetch = 0 : i64, scratch_operands = 0 : i64, tpu.core_type = #tpu.core_type<tc>, window_params = [{transform_indices = @transform_0, window_bounds = array<i64: 12, 128>}, {transform_indices = @transform_1, window_bounds = array<i64: 8, 128>}, {transform_indices = @transform_2, window_bounds = array<i64: 256, 1>}, {transform_indices = @transform_3, window_bounds = array<i64: 8, 128>}, {transform_indices = @transform_4, window_bounds = array<i64: 1, 4, 128>}]} {
    %c0_i32 = arith.constant 0 : i32
    %0 = arith.cmpi eq, %arg1, %c0_i32 : i32
    %1 = arith.extui %0 : i1 to i32
    %c0_i32_0 = arith.constant 0 : i32
    %2 = arith.cmpi ne, %1, %c0_i32_0 : i32
    scf.if %2 {
      %cst_30 = arith.constant 0.000000e+00 : f32
      %98 = vector.broadcast %cst_30 : f32 to vector<4x128xf32>
      %c0_31 = arith.constant 0 : index
      %c0_32 = arith.constant 0 : index
      %c0_33 = arith.constant 0 : index
      %99 = vector.load %arg6[%c0_31, %c0_32, %c0_33] : memref<1x4x128xf32, #tpu.memory_space<vmem>>, vector<1x4x128xf32>
      %100 = vector.shape_cast %99 : vector<1x4x128xf32> to vector<4x128xf32>
      %101 = vector.shape_cast %98 : vector<4x128xf32> to vector<1x4x128xf32>
      tpu.vector_store %arg6[%c0_31, %c0_32, %c0_33], %101 {strides = array<i32>} : memref<1x4x128xf32, #tpu.memory_space<vmem>>, vector<1x4x128xf32>,
    } else {
    }
    %c0 = arith.constant 0 : index
    %c0_1 = arith.constant 0 : index
    %3 = vector.load %arg2[%c0, %c0_1] : memref<12x128xf32, #tpu.memory_space<vmem>>, vector<12x128xf32>
    %c0_2 = arith.constant 0 : index
    %c0_3 = arith.constant 0 : index
    %4 = vector.load %arg3[%c0_2, %c0_3] : memref<8x128xf32, #tpu.memory_space<vmem>>, vector<8x128xf32>
    %5 = vector.extract_strided_slice %4 {offsets = [0, 0], sizes = [1, 128], strides = [1, 1]} : vector<8x128xf32> to vector<1x128xf32>
    %6 = vector.extract_strided_slice %4 {offsets = [1, 0], sizes = [1, 128], strides = [1, 1]} : vector<8x128xf32> to vector<1x128xf32>
    %7 = vector.extract_strided_slice %4 {offsets = [2, 0], sizes = [1, 128], strides = [1, 1]} : vector<8x128xf32> to vector<1x128xf32>
    %8 = vector.extract_strided_slice %3 {offsets = [0, 0], sizes = [6, 128], strides = [1, 1]} : vector<12x128xf32> to vector<6x128xf32>
    %9 = vector.extract_strided_slice %3 {offsets = [6, 0], sizes = [6, 128], strides = [1, 1]} : vector<12x128xf32> to vector<6x128xf32>
    %10 = vector.extract_strided_slice %8 {offsets = [0, 0], sizes = [3, 128], strides = [1, 1]} : vector<6x128xf32> to vector<3x128xf32>
    %11 = vector.extract_strided_slice %9 {offsets = [0, 0], sizes = [3, 128], strides = [1, 1]} : vector<6x128xf32> to vector<3x128xf32>
    %12 = vector.extract_strided_slice %8 {offsets = [0, 0], sizes = [3, 128], strides = [1, 1]} : vector<6x128xf32> to vector<3x128xf32>
    %13 = vector.extract_strided_slice %9 {offsets = [0, 0], sizes = [3, 128], strides = [1, 1]} : vector<6x128xf32> to vector<3x128xf32>
    %14 = arith.mulf %10, %13 : vector<3x128xf32>
    %cst = arith.constant dense<0.000000e+00> : vector<128xf32>
    %15 = vector.multi_reduction <add>, %14, %cst [0] : vector<3x128xf32> to vector<128xf32>
    %16 = vector.shape_cast %15 : vector<128xf32> to vector<1x128xf32>
    %17 = arith.mulf %11, %12 : vector<3x128xf32>
    %cst_4 = arith.constant dense<0.000000e+00> : vector<128xf32>
    %18 = vector.multi_reduction <add>, %17, %cst_4 [0] : vector<3x128xf32> to vector<128xf32>
    %19 = vector.shape_cast %18 : vector<128xf32> to vector<1x128xf32>
    %20 = arith.mulf %10, %12 : vector<3x128xf32>
    %cst_5 = arith.constant dense<0.000000e+00> : vector<128xf32>
    %21 = vector.multi_reduction <add>, %20, %cst_5 [0] : vector<3x128xf32> to vector<128xf32>
    %22 = vector.shape_cast %21 : vector<128xf32> to vector<1x128xf32>
    %23 = arith.mulf %11, %13 : vector<3x128xf32>
    %cst_6 = arith.constant dense<0.000000e+00> : vector<128xf32>
    %24 = vector.multi_reduction <add>, %23, %cst_6 [0] : vector<3x128xf32> to vector<128xf32>
    %25 = vector.shape_cast %24 : vector<128xf32> to vector<1x128xf32>
    %26 = vector.extract_strided_slice %8 {offsets = [3, 0], sizes = [3, 128], strides = [1, 1]} : vector<6x128xf32> to vector<3x128xf32>
    %27 = vector.extract_strided_slice %9 {offsets = [3, 0], sizes = [3, 128], strides = [1, 1]} : vector<6x128xf32> to vector<3x128xf32>
    %28 = arith.mulf %10, %27 : vector<3x128xf32>
    %cst_7 = arith.constant dense<0.000000e+00> : vector<128xf32>
    %29 = vector.multi_reduction <add>, %28, %cst_7 [0] : vector<3x128xf32> to vector<128xf32>
    %30 = vector.shape_cast %29 : vector<128xf32> to vector<1x128xf32>
    %31 = arith.mulf %11, %26 : vector<3x128xf32>
    %cst_8 = arith.constant dense<0.000000e+00> : vector<128xf32>
    %32 = vector.multi_reduction <add>, %31, %cst_8 [0] : vector<3x128xf32> to vector<128xf32>
    %33 = vector.shape_cast %32 : vector<128xf32> to vector<1x128xf32>
    %34 = arith.mulf %10, %26 : vector<3x128xf32>
    %cst_9 = arith.constant dense<0.000000e+00> : vector<128xf32>
    %35 = vector.multi_reduction <add>, %34, %cst_9 [0] : vector<3x128xf32> to vector<128xf32>
    %36 = vector.shape_cast %35 : vector<128xf32> to vector<1x128xf32>
    %37 = arith.mulf %11, %27 : vector<3x128xf32>
    %cst_10 = arith.constant dense<0.000000e+00> : vector<128xf32>
    %38 = vector.multi_reduction <add>, %37, %cst_10 [0] : vector<3x128xf32> to vector<128xf32>
    %39 = vector.shape_cast %38 : vector<128xf32> to vector<1x128xf32>
    %40 = vector.extract_strided_slice %8 {offsets = [3, 0], sizes = [3, 128], strides = [1, 1]} : vector<6x128xf32> to vector<3x128xf32>
    %41 = vector.extract_strided_slice %9 {offsets = [3, 0], sizes = [3, 128], strides = [1, 1]} : vector<6x128xf32> to vector<3x128xf32>
    %42 = vector.extract_strided_slice %8 {offsets = [0, 0], sizes = [3, 128], strides = [1, 1]} : vector<6x128xf32> to vector<3x128xf32>
    %43 = vector.extract_strided_slice %9 {offsets = [0, 0], sizes = [3, 128], strides = [1, 1]} : vector<6x128xf32> to vector<3x128xf32>
    %44 = arith.mulf %40, %43 : vector<3x128xf32>
    %cst_11 = arith.constant dense<0.000000e+00> : vector<128xf32>
    %45 = vector.multi_reduction <add>, %44, %cst_11 [0] : vector<3x128xf32> to vector<128xf32>
    %46 = vector.shape_cast %45 : vector<128xf32> to vector<1x128xf32>
    %47 = arith.mulf %41, %42 : vector<3x128xf32>
    %cst_12 = arith.constant dense<0.000000e+00> : vector<128xf32>
    %48 = vector.multi_reduction <add>, %47, %cst_12 [0] : vector<3x128xf32> to vector<128xf32>
    %49 = vector.shape_cast %48 : vector<128xf32> to vector<1x128xf32>
    %50 = arith.mulf %40, %42 : vector<3x128xf32>
    %cst_13 = arith.constant dense<0.000000e+00> : vector<128xf32>
    %51 = vector.multi_reduction <add>, %50, %cst_13 [0] : vector<3x128xf32> to vector<128xf32>
    %52 = vector.shape_cast %51 : vector<128xf32> to vector<1x128xf32>
    %53 = arith.mulf %41, %43 : vector<3x128xf32>
    %cst_14 = arith.constant dense<0.000000e+00> : vector<128xf32>
    %54 = vector.multi_reduction <add>, %53, %cst_14 [0] : vector<3x128xf32> to vector<128xf32>
    %55 = vector.shape_cast %54 : vector<128xf32> to vector<1x128xf32>
    %56 = vector.extract_strided_slice %8 {offsets = [3, 0], sizes = [3, 128], strides = [1, 1]} : vector<6x128xf32> to vector<3x128xf32>
    %57 = vector.extract_strided_slice %9 {offsets = [3, 0], sizes = [3, 128], strides = [1, 1]} : vector<6x128xf32> to vector<3x128xf32>
    %58 = arith.mulf %40, %57 : vector<3x128xf32>
    %cst_15 = arith.constant dense<0.000000e+00> : vector<128xf32>
    %59 = vector.multi_reduction <add>, %58, %cst_15 [0] : vector<3x128xf32> to vector<128xf32>
    %60 = vector.shape_cast %59 : vector<128xf32> to vector<1x128xf32>
    %61 = arith.mulf %41, %56 : vector<3x128xf32>
    %cst_16 = arith.constant dense<0.000000e+00> : vector<128xf32>
    %62 = vector.multi_reduction <add>, %61, %cst_16 [0] : vector<3x128xf32> to vector<128xf32>
    %63 = vector.shape_cast %62 : vector<128xf32> to vector<1x128xf32>
    %64 = arith.mulf %40, %56 : vector<3x128xf32>
    %cst_17 = arith.constant dense<0.000000e+00> : vector<128xf32>
    %65 = vector.multi_reduction <add>, %64, %cst_17 [0] : vector<3x128xf32> to vector<128xf32>
    %66 = vector.shape_cast %65 : vector<128xf32> to vector<1x128xf32>
    %67 = arith.mulf %41, %57 : vector<3x128xf32>
    %cst_18 = arith.constant dense<0.000000e+00> : vector<128xf32>
    %68 = vector.multi_reduction <add>, %67, %cst_18 [0] : vector<3x128xf32> to vector<128xf32>
    %69 = vector.shape_cast %68 : vector<128xf32> to vector<1x128xf32>
    %70 = tpu.concatenate %16, %30, %46, %60 in 0 : vector<1x128xf32>, vector<1x128xf32>, vector<1x128xf32>, vector<1x128xf32> -> vector<4x128xf32>
    %71 = vector.broadcast %5 : vector<1x128xf32> to vector<4x128xf32>
    %72 = arith.mulf %70, %71 : vector<4x128xf32>
    %73 = tpu.concatenate %19, %33, %49, %63 in 0 : vector<1x128xf32>, vector<1x128xf32>, vector<1x128xf32>, vector<1x128xf32> -> vector<4x128xf32>
    %74 = vector.broadcast %5 : vector<1x128xf32> to vector<4x128xf32>
    %75 = arith.mulf %73, %74 : vector<4x128xf32>
    %76 = tpu.concatenate %22, %36, %52, %66 in 0 : vector<1x128xf32>, vector<1x128xf32>, vector<1x128xf32>, vector<1x128xf32> -> vector<4x128xf32>
    %77 = vector.broadcast %6 : vector<1x128xf32> to vector<4x128xf32>
    %78 = arith.mulf %76, %77 : vector<4x128xf32>
    %79 = tpu.concatenate %25, %39, %55, %69 in 0 : vector<1x128xf32>, vector<1x128xf32>, vector<1x128xf32>, vector<1x128xf32> -> vector<4x128xf32>
    %80 = vector.broadcast %7 : vector<1x128xf32> to vector<4x128xf32>
    %81 = arith.mulf %79, %80 : vector<4x128xf32>
    %82 = tpu.concatenate %72, %75 in 0 : vector<4x128xf32>, vector<4x128xf32> -> vector<8x128xf32>
    %c0_19 = arith.constant 0 : index
    %c0_20 = arith.constant 0 : index
    %83 = vector.load %arg5[%c0_19, %c0_20] : memref<8x128xf32, #tpu.memory_space<vmem>>, vector<8x128xf32>
    tpu.vector_store %arg5[%c0_19, %c0_20], %82 {strides = array<i32>} : memref<8x128xf32, #tpu.memory_space<vmem>>, vector<8x128xf32>,
    %c0_21 = arith.constant 0 : index
    %c0_22 = arith.constant 0 : index
    %84 = vector.load %arg4[%c0_21, %c0_22] : memref<256x1xi32, #tpu.memory_space<vmem>>, vector<256x1xi32>
    %85 = tpu.iota {dimensions = array<i32: 1>} : vector<256x128xi32>
    %86 = vector.broadcast %84 : vector<256x1xi32> to vector<256x128xi32>
    %87 = arith.cmpi eq, %85, %86 : vector<256x128xi32>
    %88 = arith.extui %87 : vector<256x128xi1> to vector<256x128xi32>
    %89 = arith.sitofp %88 : vector<256x128xi32> to vector<256x128xf32>
    %90 = tpu.concatenate %78, %81 in 1 : vector<4x128xf32>, vector<4x128xf32> -> vector<4x256xf32>
    %c0_23 = arith.constant 0 : index
    %c0_24 = arith.constant 0 : index
    %c0_25 = arith.constant 0 : index
    %91 = vector.load %arg6[%c0_23, %c0_24, %c0_25] : memref<1x4x128xf32, #tpu.memory_space<vmem>>, vector<1x4x128xf32>
    %92 = vector.shape_cast %91 : vector<1x4x128xf32> to vector<4x128xf32>
    %cst_26 = arith.constant dense<0.000000e+00> : vector<4x128xf32>
    %93 = tpu.matmul %90, %89, %cst_26 {dimension_numbers = #tpu.dot_dimension_numbers<[1], [0], [0], [1], [0, 0, 1, 1], [], []>} : vector<4x256xf32>, vector<256x128xf32>, vector<4x128xf32> -> vector<4x128xf32>
    %94 = arith.addf %92, %93 : vector<4x128xf32>
    %c0_27 = arith.constant 0 : index
    %c0_28 = arith.constant 0 : index
    %c0_29 = arith.constant 0 : index
    %95 = vector.load %arg6[%c0_27, %c0_28, %c0_29] : memref<1x4x128xf32, #tpu.memory_space<vmem>>, vector<1x4x128xf32>
    %96 = vector.shape_cast %95 : vector<1x4x128xf32> to vector<4x128xf32>
    %97 = vector.shape_cast %94 : vector<4x128xf32> to vector<1x4x128xf32>
    tpu.vector_store %arg6[%c0_27, %c0_28, %c0_29], %97 {strides = array<i32>} : memref<1x4x128xf32, #tpu.memory_space<vmem>>, vector<1x4x128xf32>,
    return
  }
  func.func @transform_0(%arg0: i32, %arg1: i32) -> (i32, i32) {
    %c1_i32 = arith.constant 1 : i32
    %0 = arith.muli %arg0, %c1_i32 : i32
    %1 = arith.addi %0, %arg1 : i32
    %c0_i32 = arith.constant 0 : i32
    %c0_i32_0 = arith.constant 0 : i32
    return %c0_i32, %1 : i32, i32
  }
  func.func @transform_1(%arg0: i32, %arg1: i32) -> (i32, i32) {
    %c1_i32 = arith.constant 1 : i32
    %0 = arith.muli %arg0, %c1_i32 : i32
    %1 = arith.addi %0, %arg1 : i32
    %c0_i32 = arith.constant 0 : i32
    %c0_i32_0 = arith.constant 0 : i32
    return %c0_i32, %1 : i32, i32
  }
  func.func @transform_2(%arg0: i32, %arg1: i32) -> (i32, i32) {
    %c1_i32 = arith.constant 1 : i32
    %0 = arith.muli %arg0, %c1_i32 : i32
    %1 = arith.addi %0, %arg1 : i32
    %c0_i32 = arith.constant 0 : i32
    %c0_i32_0 = arith.constant 0 : i32
    return %1, %c0_i32 : i32, i32
  }
  func.func @transform_3(%arg0: i32, %arg1: i32) -> (i32, i32) {
    %c1_i32 = arith.constant 1 : i32
    %0 = arith.muli %arg0, %c1_i32 : i32
    %1 = arith.addi %0, %arg1 : i32
    %c0_i32 = arith.constant 0 : i32
    %c0_i32_0 = arith.constant 0 : i32
    return %c0_i32, %1 : i32, i32
  }
  func.func @transform_4(%arg0: i32, %arg1: i32) -> (i32, i32, i32) {
    %c0_i32 = arith.constant 0 : i32
    %c0_i32_0 = arith.constant 0 : i32
    %c0_i32_1 = arith.constant 0 : i32
    return %arg0, %c0_i32, %c0_i32_0 : i32, i32, i32
  }
}

</mosaic_0001>

<bundles_post_ra>
// kernel: tpu_custom_call.1
= control target key start
LH: loop header
LB: loop body
LE: loop exit
PB: predicated region body
PF: predicated region fallthrough
CT: control target
= control target key end

     0   :  { %10 = vsyncpa [#allocation3], 0  ;;  %v774_v2 = vmov 0   ;;  %s1038_s0 = inlined_call_operand.vmem [shape: f32[12,128], index: 0, kind: input, shape index: {}]   ;;  %s1039_s1 = inlined_call_operand.vmem [shape: f32[8,128], index: 1, kind: input, shape index: {}]   ;;  %s1040_s2 = inlined_call_operand.vmem [shape: s32[256,1], index: 2, kind: input, shape index: {}]   ;;  %s1041_s3 = inlined_call_operand.hbm [shape: f32[8,128], index: 3, kind: output, shape index: {0}]   ;;  %s1042_s4 = inlined_call_operand.hbm [shape: f32[1,4,128], index: 4, kind: output, shape index: {1}]  }
   0x1   :  { %v256_v0 = vld [vmem:[%s1040_s2 + $0x80] sm:$0xff]  ;;  %725 = vset.pattern.permute.xlu1 %v774_v2  ;;  %724 = vset.pattern.permute.xlu0 %v774_v2  ;;  %v257_v3 = vld [vmem:[%s1040_s2 + $0x88] sm:$0xff]  ;;  %v258_v5 = vld [vmem:[%s1040_s2 + $0x90] sm:$0xff] }
   0x2   :  { %v240_v1 = vld [vmem:[%s1040_s2] sm:$0xff]  ;;  %323 = vperm.xlu0 %724, %v256_v0   ;;  %v241_v4 = vld [vmem:[%s1040_s2 + $0x8] sm:$0xff]  ;;  %v259_v6 = vld [vmem:[%s1040_s2 + $0x98] sm:$0xff] }
   0x3   :  { %275 = vperm.xlu1 %725, %v240_v1  }
   0x6   :  { %326 = vperm.xlu0 %724, %v257_v3  }
   0x7   :  { %278 = vperm.xlu1 %725, %v241_v4  }
   0xa   :  { %329 = vperm.xlu0 %724, %v258_v5  }
   0xb   :  { %332 = vperm.xlu1 %725, %v259_v6  }
   0xc   :  { %11 = vsyncpa [#allocation5], 0  ;;  %v242_v7 = vld [vmem:[%s1040_s2 + $0x10] sm:$0xff]  ;;  %v243_v8 = vld [vmem:[%s1040_s2 + $0x18] sm:$0xff]  ;;  %vm85_vm0 = vcmask 1041408   ;;  %vm91_vm1 = vcmask 1042432  }
   0xd   :  { %v260_v9 = vld [vmem:[%s1040_s2 + $0xa0] sm:$0xff]  ;;  %v261_v10 = vld [vmem:[%s1040_s2 + $0xa8] sm:$0xff]  ;;  %v262_v13 = vld [vmem:[%s1040_s2 + $0xb0] sm:$0xff]  ;;  %vm205_vm2 = vcmask 1040384  }
   0xe   :  { %281 = vperm.xlu0 %724, %v242_v7   ;;  %v244_v11 = vld [vmem:[%s1040_s2 + $0x20] sm:$0xff]  ;;  %v245_v12 = vld [vmem:[%s1040_s2 + $0x28] sm:$0xff]  ;;  %v263_v14 = vld [vmem:[%s1040_s2 + $0xb8] sm:$0xff] }
   0xf   :  { %284 = vperm.xlu1 %725, %v243_v8   ;;  %v246_v15 = vld [vmem:[%s1040_s2 + $0x30] sm:$0xff]  ;;  %v247_v16 = vld [vmem:[%s1040_s2 + $0x38] sm:$0xff]  ;;  %v264_v17 = vld [vmem:[%s1040_s2 + $0xc0] sm:$0xff]  ;;  %v209_v8 = vlaneseq }
  0x10   :  { %v265_v18 = vld [vmem:[%s1040_s2 + $0xc8] sm:$0xff]  ;;  %v248_v19 = vld [vmem:[%s1040_s2 + $0x40] sm:$0xff]  ;;  %v266_v21 = vld [vmem:[%s1040_s2 + $0xd0] sm:$0xff] }
  0x11   :  { %v249_v20 = vld [vmem:[%s1040_s2 + $0x48] sm:$0xff]  ;;  %v267_v22 = vld [vmem:[%s1040_s2 + $0xd8] sm:$0xff]  ;;  %v250_v25 = vld [vmem:[%s1040_s2 + $0x50] sm:$0xff] }
  0x12   :  { %335 = vperm.xlu0 %724, %v260_v9   ;;  %v873_v23 = vld [vmem:[%s1038_s0 + $0x8] sm:$0xf]  ;;  %v251_v26 = vld [vmem:[%s1040_s2 + $0x58] sm:$0xff]  ;;  %v885_v27 = vld [vmem:[%s1038_s0] sm:$0xff] }
  0x13   :  { %338 = vperm.xlu1 %725, %v261_v10   ;;  %v158_v24 = vrot.slane %v873_v23, 3  ;;  %v99_v28 = vmul.f32 %v885_v27, %v885_v27  ;;  %v107_v29 = vmul.f32 %v873_v23, %v873_v23  ;;  %v268_v36 = vld [vmem:[%s1040_s2 + $0xe0] sm:$0xff]  ;;  %v269_v37 = vld [vmem:[%s1040_s2 + $0xe8] sm:$0xff]  ;;  %v148_v38 = vrot.slane %v885_v27, 3  ;;  %v270_v0 = vld [vmem:[%s1040_s2 + $0xf0] sm:$0xff] }
  0x14   :  { %v252_v49 = vld [vmem:[%s1040_s2 + $0x60] sm:$0xff]  ;;  %v253_v50 = vld [vmem:[%s1040_s2 + $0x68] sm:$0xff]  ;;  %v271_v1 = vld [vmem:[%s1040_s2 + $0xf8] sm:$0xff] }
  0x15   :  { %v160_v30 = vmul.f32 %v158_v24, %v885_v27  ;;  %v161_v31 = vmul.f32 %v158_v24, %v873_v23  ;;  %v110_v32 = vrot.slane %v99_v28, 6  ;;  %v111_v33 = vrot.slane %v107_v29, 6 }
  0x16   :  { %287 = vperm.xlu0 %724, %v244_v11   ;;  %v196_v43 = vrot.slane %v107_v29, 1  ;;  %v150_v44 = vmul.f32 %v148_v38, %v885_v27  ;;  %v100_v47 = vsel %vm91_vm1, %v99_v28, 0.0  ;;  %v187_v48 = vrot.slane %v99_v28, 3  ;;  %v82_v29 = vld [vmem:[%s1039_s1] sm:$0xff]  ;;  %s777_s1 = smov [#allocation2]  }
  0x17   :  { %290 = vperm.xlu1 %725, %v245_v12   ;;  %v164_v34 = vrot.slane %v160_v30, 6  ;;  %v165_v35 = vrot.slane %v161_v31, 6  ;;  %v112_v39 = vsel %vm85_vm0, %v110_v32, %v111_v33  ;;  %v101_v52 = vrot.slane %v100_v47, 4 }
  0x18   :  { %v114_v41 = vsel %vm91_vm1, %v112_v39, 0.0  ;;  %v198_v51 = vsel %vm91_vm1, %v196_v43, 0.0  ;;  %v151_v53 = vsel %vm91_vm1, %v150_v44, 0.0  ;;  %v189_v59 = vsel %vm91_vm1, %v187_v48, 0.0 }
  0x19   :  { %v166_v40 = vsel %vm85_vm0, %v164_v34, %v165_v35  ;;  %v115_v45 = vrot.slane %v114_v41, 4  ;;  %v199_v56 = vrot.slane %v198_v51, 4  ;;  %v152_v57 = vrot.slane %v151_v53, 4 }
  0x1a   :  { %341 = vperm.xlu0 %724, %v262_v13   ;;  %v168_v42 = vsel %vm91_vm1, %v166_v40, 0.0  ;;  %v102_v58 = vadd.f32 %v101_v52, %v100_v47  ;;  %v190_v3 = vrot.slane %v189_v59, 4  ;;  %v775_v52 = vmov 1.0|1.0  }
  0x1b   :  { %344 = vperm.xlu1 %725, %v263_v14   ;;  %v169_v46 = vrot.slane %v168_v42, 4  ;;  %v116_v54 = vadd.f32 %v115_v45, %v114_v41  ;;  %v200_v62 = vadd.f32 %v199_v56, %v198_v51  ;;  %v153_v63 = vadd.f32 %v152_v57, %v151_v53 }
  0x1c   :  { %v103_v2 = vrot.slane %v102_v58, 2  ;;  %v191_v10 = vadd.f32 %v190_v3, %v189_v59 }
  0x1d   :  { %v170_v55 = vadd.f32 %v169_v46, %v168_v42  ;;  %v117_v60 = vrot.slane %v116_v54, 2  ;;  %v201_v6 = vrot.slane %v200_v62, 2  ;;  %v154_v7 = vrot.slane %v153_v63, 2 }
  0x1e   :  { %293 = vperm.xlu0 %724, %v246_v15   ;;  %v104_v9 = vadd.f32 %v103_v2, %v102_v58  ;;  %v254_v15 = vld [vmem:[%s1040_s2 + $0x70] sm:$0xff] }
  0x1f   :  { %296 = vperm.xlu1 %725, %v247_v16   ;;  %v171_v61 = vrot.slane %v170_v55, 2  ;;  %v118_v4 = vadd.f32 %v117_v60, %v116_v54  ;;  %v202_v13 = vadd.f32 %v201_v6, %v200_v62  ;;  %v155_v14 = vadd.f32 %v154_v7, %v153_v63  ;;  %v255_v16 = vld [vmem:[%s1040_s2 + $0x78] sm:$0xff]  ;;  %s548_s2 = sshll.u32 %s777_s1, 4  ;;  %s549_s2 = int_to_ptr.vmem [resolvable:$true] %s548_s2 }
  0x20   :  { %s726_s6 = scalar_lea.vmem %s549_s2, 128  ;;  %p731_p1 = scmp.lt.s32.totalorder %s549_s2, %s549_s2 }
  0x21   :  { %v172_v5 = vadd.f32 %v171_v61, %v170_v55  ;;  %v119_v11 = vrot.slane %v118_v4, 1  ;;  %v156_v24 = vrot.slane %v155_v14, 1  ;;  %p727_p0 = scmp.ne.s32.totalorder %s549_s2, %s726_s6  ;;  %p732_p2 = scmp.lt.s32.totalorder %s726_s6, %s726_s6 }
  0x22   :  { %347 = vperm.xlu0 %724, %v264_v17   ;;  %v210_v17 = vshrl.u32 %v209_v8, 7 }
  0x23   :  { %350 = vperm.xlu1 %725, %v265_v18   ;;  %v173_v12 = vrot.slane %v172_v5, 1  ;;  %v105_v18 = vrot.slane %v104_v9, 1  ;;  %v157_v32 = vadd.f32 %v156_v24, %v155_v14  ;;  %v121_v24 = vrot.slane %v873_v23, 1  ;;  %p733_p3 = por %p732_p2, %p731_p1 }
  0x24   :  { %v223_v33 = vsub.s32 1, %v210_v17 }
  0x25   :  { %p734_p4 = pnand %p733_p3, %p727_p0 }
  0x26   :  { %299 = vperm.xlu0 %724, %v248_v19   ;;  %v192_v19 = vrot.slane %v191_v10, 2  ;;  %v224_v40 = vrot.slane %v82_v29, %v223_v33 }
  0x27   :  { %302 = vperm.xlu1 %725, %v249_v20   ;;  %v120_v20 = vadd.f32 %v119_v11, %v118_v4 }
  0x28   :  { %v193_v28 = vadd.f32 %v192_v19, %v191_v10  ;;  %v87_v19 = vrot.slane %v873_v23, 6 }
  0x2a   :  { %353 = vperm.xlu0 %724, %v266_v21   ;;  %v174_v21 = vadd.f32 %v173_v12, %v172_v5 }
  0x2b   :  { %356 = vperm.xlu1 %725, %v267_v22   ;;  %v203_v22 = vrot.slane %v202_v13, 1 }
  0x2c   :  { %v226_v31 = vsel %vm205_vm2, %v120_v20, %v174_v21 }
  0x2d   :  { %v204_v30 = vadd.f32 %v203_v22, %v202_v13  ;;  %v227_v34 = vsel %vm85_vm0, %v226_v31, %v174_v21 }
  0x2e   :  { %305 = vperm.xlu0 %724, %v250_v25   ;;  %v231_v25 = vsub.s32 2, %v210_v17 }
  0x2f   :  { %308 = vperm.xlu1 %725, %v251_v26   ;;  %v106_v26 = vadd.f32 %v105_v18, %v104_v9  ;;  %v228_v38 = vsel %vm91_vm1, %v227_v34, %v204_v30  ;;  %v86_v18 = vrot.slane %v885_v27, 6  ;;  %v123_v30 = vmul.f32 %v121_v24, %v885_v27 }
  0x30   :  { %v232_v35 = vrot.slane %v82_v29, %v231_v25 }
  0x31   :  { %v218_v39 = vsel %vm205_vm2, %v106_v26, %v157_v32  ;;  %v88_v22 = vsel %vm85_vm0, %v86_v18, %v87_v19 }
  0x32   :  { %359 = vperm.xlu0 %724, %v268_v36   ;;  %v194_v36 = vrot.slane %v193_v28, 1  ;;  %v233_v41 = vmul.f32 %v232_v35, %v228_v38  ;;  %v219_v43 = vsel %vm85_vm0, %v218_v39, %v157_v32 }
  0x33   :  { %362 = vperm.xlu1 %725, %v269_v37   ;;  %v211_v37 = vsub.s32 0, %v210_v17  ;;  %v131_v17 = vrot.slane %v885_v27, 5 }
  0x34   :  { %v195_v42 = vadd.f32 %v194_v36, %v193_v28  ;;  %531 = vmatprep.mubr.f32.mxu0 %v233_v41  ;;  %v90_v28 = vmul.f32 %v88_v22, %v885_v27  ;;  %v124_v36 = vsel %vm91_vm1, %v123_v30, 0.0 }
  0x35   :  { %v935_v44 = vrot.slane %v82_v29, %v211_v37  ;;  %v133_v20 = vmul.f32 %v131_v17, %v885_v27  ;;  %v134_v21 = vmul.f32 %v131_v17, %v873_v23  ;;  %v176_v29 = vmul.f32 %v87_v19, %v885_v27 }
  0x36   :  { %311 = vperm.xlu0 %724, %v252_v49   ;;  %v220_v45 = vsel %vm91_vm1, %v219_v43, %v195_v42  ;;  %v940_v49 = vand.u32 127, %v209_v8  ;;  %v92_v32 = vsel %vm91_vm1, %v90_v28, 0.0  ;;  %v125_v23 = vrot.slane %v124_v36, 4 }
  0x37   :  { %314 = vperm.xlu1 %725, %v253_v50   ;;  %v938_v46 = vmul.f32 %v224_v40, %v220_v45  ;;  %v137_v25 = vrot.slane %v133_v20, 6  ;;  %v138_v26 = vrot.slane %v134_v21, 6  ;;  %v178_v34 = vrot.slane %v176_v29, 3 }
  0x38   :  { %v93_v35 = vrot.slane %v92_v32, 4  ;;  %v126_v42 = vadd.f32 %v125_v23, %v124_v36 }
  0x39   :  { %v139_v31 = vsel %vm85_vm0, %v137_v25, %v138_v26  ;;  %v180_v38 = vsel %vm91_vm1, %v178_v34, 0.0 }
  0x3a   :  { %365 = vperm.xlu0 %724, %v270_v0   ;;  %v141_v33 = vsel %vm91_vm1, %v139_v31, 0.0  ;;  %v94_v39 = vadd.f32 %v93_v35, %v92_v32  ;;  %v181_v41 = vrot.slane %v180_v38, 4 }
  0x3b   :  { %368 = vperm.xlu1 %725, %v271_v1   ;;  %v142_v37 = vrot.slane %v141_v33, 4 }
  0x3c   :  { %v95_v43 = vrot.slane %v94_v39, 2  ;;  %v182_v45 = vadd.f32 %v181_v41, %v180_v38 }
  0x3d   :  { %v143_v40 = vadd.f32 %v142_v37, %v141_v33 }
  0x3e   :  { %317 = vperm.xlu0 %724, %v254_v15  }
  0x3f   :  { %320 = vperm.xlu1 %725, %v255_v16   ;;  %v144_v27 = vrot.slane %v143_v40, 2 }
  0x81   :  { %v324_v47 = vpop.permute.xlu0 %323 }
  0x82   :  { %v276_v48 = vpop.permute.xlu1 %275  ;;  %vm386_vm6 = vcmp.eq.s32.totalorder %v940_v49, %v324_v47  ;;  %v96_v47 = vadd.f32 %v95_v43, %v94_v39 }
  0x83   :  { %vm370_vm3 = vcmp.eq.s32.totalorder %v940_v49, %v276_v48  ;;  %v145_v48 = vadd.f32 %v144_v27, %v143_v40 }
  0x85   :  { %v327_v50 = vpop.permute.xlu0 %326 }
  0x86   :  { %v279_v51 = vpop.permute.xlu1 %278  ;;  %vm387_vm4 = vcmp.eq.s32.totalorder %v940_v49, %v327_v50 }
  0x87   :  { %vm371_vm5 = vcmp.eq.s32.totalorder %v940_v49, %v279_v51  ;;  %vm687_vm8 = vmpackc.low %vm387_vm4, %vm386_vm6  ;;  %v97_v51 = vrot.slane %v96_v47, 1 }
  0x88   :  { %vm689_vm7 = vmpackc.low %vm371_vm5, %vm370_vm3  ;;  %688 = vmatprep.subr.msk.bf16.mxu0 %vm687_vm8, %v775_v52 }
  0x89   :  { %v330_v53 = vpop.permute.xlu0 %329  ;;  %690 = vmatpush3.bf16.msk.msra.mxu0 %vm689_vm7, %v775_v52 }
  0x8a   :  { %v333_v54 = vpop.permute.xlu1 %332  ;;  %vm388_vm9 = vcmp.eq.s32.totalorder %v940_v49, %v330_v53 }
  0x8b   :  { %vm389_vm10 = vcmp.eq.s32.totalorder %v940_v49, %v333_v54 }
  0x8c   :  { %vm691_vm11 = vmpackc.low %vm389_vm10, %vm388_vm9 }
  0x8d   :  { %692 = vmatprep.subr.msk.bf16.mxu0 %vm691_vm11, %v775_v52  ;;  %v282_v55 = vpop.permute.xlu0 %281 }
  0x8e   :  { %v285_v56 = vpop.permute.xlu1 %284  ;;  %vm372_vm12 = vcmp.eq.s32.totalorder %v940_v49, %v282_v55  ;;  %v776_v55 = vmov 0.0  }
  0x8f   :  { %vm373_vm13 = vcmp.eq.s32.totalorder %v940_v49, %v285_v56  ;;  %79 = vst [vmem:[#allocation4] sm:$0xf] %v776_v55  ;;  %v98_v56 = vadd.f32 %v97_v51, %v96_v47 }
  0x90   :  { %vm693_vm14 = vmpackc.low %vm373_vm13, %vm372_vm12 }
  0x91   :  { %694 = vmatpush3.bf16.msk.msra.mxu0 %vm693_vm14, %v775_v52  ;;  %v336_v57 = vpop.permute.xlu0 %335 }
  0x92   :  { %v339_v58 = vpop.permute.xlu1 %338  ;;  %vm390_vm15 = vcmp.eq.s32.totalorder %v940_v49, %v336_v57 }
  0x93   :  { %vm391_vm3 = vcmp.eq.s32.totalorder %v940_v49, %v339_v58 }
  0x94   :  { %vm695_vm4 = vmpackc.low %vm391_vm3, %vm390_vm15 }
  0x95   :  { %696 = vmatprep.subr.msk.bf16.mxu0 %vm695_vm4, %v775_v52  ;;  %v288_v59 = vpop.permute.xlu0 %287 }
  0x96   :  { %v291_v60 = vpop.permute.xlu1 %290  ;;  %vm374_vm5 = vcmp.eq.s32.totalorder %v940_v49, %v288_v59 }
  0x97   :  { %vm375_vm6 = vcmp.eq.s32.totalorder %v940_v49, %v291_v60 }
  0x98   :  { %vm697_vm7 = vmpackc.low %vm375_vm6, %vm374_vm5 }
  0x99   :  { %698 = vmatpush3.bf16.msk.msra.mxu0 %vm697_vm7, %v775_v52  ;;  %v342_v61 = vpop.permute.xlu0 %341 }
  0x9a   :  { %v345_v62 = vpop.permute.xlu1 %344  ;;  %vm392_vm8 = vcmp.eq.s32.totalorder %v940_v49, %v342_v61 }
  0x9b   :  { %vm393_vm9 = vcmp.eq.s32.totalorder %v940_v49, %v345_v62 }
  0x9c   :  { %vm699_vm10 = vmpackc.low %vm393_vm9, %vm392_vm8 }
  0x9d   :  { %700 = vmatprep.subr.msk.bf16.mxu0 %vm699_vm10, %v775_v52  ;;  %v294_v63 = vpop.permute.xlu0 %293 }
  0x9e   :  { %v297_v0 = vpop.permute.xlu1 %296  ;;  %vm376_vm11 = vcmp.eq.s32.totalorder %v940_v49, %v294_v63 }
  0x9f   :  { %vm377_vm12 = vcmp.eq.s32.totalorder %v940_v49, %v297_v0 }
  0xa0   :  { %vm701_vm13 = vmpackc.low %vm377_vm12, %vm376_vm11 }
  0xa1   :  { %702 = vmatpush3.bf16.msk.msra.mxu0 %vm701_vm13, %v775_v52  ;;  %v348_v1 = vpop.permute.xlu0 %347 }
  0xa2   :  { %v351_v2 = vpop.permute.xlu1 %350  ;;  %vm394_vm14 = vcmp.eq.s32.totalorder %v940_v49, %v348_v1 }
  0xa3   :  { %vm395_vm15 = vcmp.eq.s32.totalorder %v940_v49, %v351_v2 }
  0xa4   :  { %vm703_vm3 = vmpackc.low %vm395_vm15, %vm394_vm14 }
  0xa5   :  { %704 = vmatprep.subr.msk.bf16.mxu0 %vm703_vm3, %v775_v52  ;;  %v300_v3 = vpop.permute.xlu0 %299 }
  0xa6   :  { %v303_v4 = vpop.permute.xlu1 %302  ;;  %vm378_vm4 = vcmp.eq.s32.totalorder %v940_v49, %v300_v3 }
  0xa7   :  { %vm379_vm5 = vcmp.eq.s32.totalorder %v940_v49, %v303_v4 }
  0xa8   :  { %vm705_vm6 = vmpackc.low %vm379_vm5, %vm378_vm4 }
  0xa9   :  { %706 = vmatpush3.bf16.msk.msra.mxu0 %vm705_vm6, %v775_v52  ;;  %v354_v5 = vpop.permute.xlu0 %353 }
  0xaa   :  { %v357_v6 = vpop.permute.xlu1 %356  ;;  %vm396_vm7 = vcmp.eq.s32.totalorder %v940_v49, %v354_v5 }
  0xab   :  { %vm397_vm8 = vcmp.eq.s32.totalorder %v940_v49, %v357_v6 }
  0xac   :  { %vm707_vm9 = vmpackc.low %vm397_vm8, %vm396_vm7 }
  0xad   :  { %708 = vmatprep.subr.msk.bf16.mxu0 %vm707_vm9, %v775_v52  ;;  %v306_v7 = vpop.permute.xlu0 %305 }
  0xae   :  { %v309_v8 = vpop.permute.xlu1 %308  ;;  %vm380_vm10 = vcmp.eq.s32.totalorder %v940_v49, %v306_v7 }
  0xaf   :  { %vm381_vm11 = vcmp.eq.s32.totalorder %v940_v49, %v309_v8 }
  0xb0   :  { %vm709_vm12 = vmpackc.low %vm381_vm11, %vm380_vm10 }
  0xb1   :  { %710 = vmatpush3.bf16.msk.msra.mxu0 %vm709_vm12, %v775_v52  ;;  %v360_v9 = vpop.permute.xlu0 %359  ;;  %vm237_vm12 = vcmask 1043456  }
  0xb2   :  { %v363_v10 = vpop.permute.xlu1 %362  ;;  %vm398_vm13 = vcmp.eq.s32.totalorder %v940_v49, %v360_v9 }
  0xb3   :  { %vm399_vm14 = vcmp.eq.s32.totalorder %v940_v49, %v363_v10 }
  0xb4   :  { %vm711_vm15 = vmpackc.low %vm399_vm14, %vm398_vm13 }
  0xb5   :  { %712 = vmatprep.subr.msk.bf16.mxu0 %vm711_vm15, %v775_v52  ;;  %v312_v11 = vpop.permute.xlu0 %311 }
  0xb6   :  { %v315_v12 = vpop.permute.xlu1 %314  ;;  %vm382_vm3 = vcmp.eq.s32.totalorder %v940_v49, %v312_v11 }
  0xb7   :  { %vm383_vm4 = vcmp.eq.s32.totalorder %v940_v49, %v315_v12 }
  0xb8   :  { %vm713_vm5 = vmpackc.low %vm383_vm4, %vm382_vm3 }
  0xb9   :  { %714 = vmatpush3.bf16.msk.msra.mxu0 %vm713_vm5, %v775_v52  ;;  %v366_v13 = vpop.permute.xlu0 %365 }
  0xba   :  { %v369_v14 = vpop.permute.xlu1 %368  ;;  %vm400_vm6 = vcmp.eq.s32.totalorder %v940_v49, %v366_v13 }
  0xbb   :  { %vm401_vm7 = vcmp.eq.s32.totalorder %v940_v49, %v369_v14 }
  0xbc   :  { %vm715_vm8 = vmpackc.low %vm401_vm7, %vm400_vm6 }
  0xbd   :  { %716 = vmatprep.subr.msk.bf16.mxu0 %vm715_vm8, %v775_v52  ;;  %v318_v15 = vpop.permute.xlu0 %317 }
  0xbe   :  { %v321_v16 = vpop.permute.xlu1 %320  ;;  %vm384_vm9 = vcmp.eq.s32.totalorder %v940_v49, %v318_v15 }
  0xbf   :  { %vm385_vm10 = vcmp.eq.s32.totalorder %v940_v49, %v321_v16  ;;  %v183_v49 = vrot.slane %v182_v45, 2 }
  0xc0   :  { %vm717_vm11 = vmpackc.low %vm385_vm10, %vm384_vm9 }
  0xc1   :  { %718 = vmatpush3.bf16.msk.msra.mxu0 %vm717_vm11, %v775_v52  ;;  %v146_v52 = vrot.slane %v145_v48, 1  ;;  %v184_v53 = vadd.f32 %v183_v49, %v182_v45 }
  0xc3   :  { %v147_v57 = vadd.f32 %v146_v52, %v145_v48  ;;  %v185_v58 = vrot.slane %v184_v53, 1 }
  0xc4   :  { %532 = vmatmul.mubr.f32.vlgmr.msra.gmra.mrb[0].mxu0 %v938_v46  ;;  %v127_v46 = vrot.slane %v126_v42, 2 }
  0xc5   :  { %v186_v60 = vadd.f32 %v185_v58, %v184_v53  ;;  %v214_v61 = vsel %vm205_vm2, %v98_v56, %v147_v57 }
  0xc6   :  { %v128_v50 = vadd.f32 %v127_v46, %v126_v42 }
  0xc8   :  { %v129_v54 = vrot.slane %v128_v50, 1 }
  0xca   :  { %v130_v59 = vadd.f32 %v129_v54, %v128_v50 }
  0xcc   :  { %v215_v62 = vsel %vm85_vm0, %v214_v61, %v130_v59  ;;  %v206_v63 = vsel %vm205_vm2, %v98_v56, %v130_v59 }
  0xcd   :  { %v216_v0 = vsel %vm91_vm1, %v215_v62, %v186_v60  ;;  %v207_v1 = vsel %vm85_vm0, %v206_v63, %v147_v57 }
  0xce   :  { %v217_v2 = vmul.f32 %v216_v0, %v935_v44  ;;  %v208_v3 = vsel %vm91_vm1, %v207_v1, %v186_v60 }
  0xcf   :  { %v213_v4 = vmul.f32 %v935_v44, %v208_v3 }
  0xd0   :  { %v235_v5 = vrot.slane %v217_v2, 4 }
  0xd2   :  { %v238_v6 = vsel %vm237_vm12, %v213_v4, %v235_v5 }
  0xd3   :  { %239 = vst [vmem:[#allocation2] sm:$0xff] %v238_v6 }
  0xd4   :  { %737 = shalt.err (!%p734_p4)
}
  0xd5   :  { %s738_s9 = scalar_lea.hbm %s1041_s3, 128 }
  0xd6   :  { %p739_p5 = scmp.ne.s32.totalorder %s1041_s3, %s738_s9  ;;  %p742_p6 = scmp.lt.u32.totalorder %s738_s9, %s1041_s3 }
  0xd8   :  { %p744_p7 = pnand %p742_p6, %p739_p5 }
  0xda   :  { %747 = shalt.err (!%p744_p7)
}
  0xdb   :  { %551 = dma.vmem_to_hbm [thread:$0]  %s549_s2, 128, %s1041_s3, [#allocation3]   ;;  %v466_v7 = vld [vmem:[#allocation4] sm:$0xf] }
  0xdc   :  { %s778_s16 = smov [#allocation4]  }
  0xdd   :  { %s558_s0 = sshll.u32 %s778_s16, 4  ;;  %s559_s0 = int_to_ptr.vmem [resolvable:$true] %s558_s0 }
  0xde   :  { %s748_s17 = scalar_lea.vmem %s559_s0, 64  ;;  %p753_p9 = scmp.lt.s32.totalorder %s559_s0, %s559_s0 }
  0xdf   :  { %p749_p8 = scmp.ne.s32.totalorder %s559_s0, %s748_s17  ;;  %p754_p10 = scmp.lt.s32.totalorder %s748_s17, %s748_s17 }
  0xe1   :  { %p755_p11 = por %p754_p10, %p753_p9 }
  0xe3   :  { %p756_p12 = pnand %p755_p11, %p749_p8 }
 0x197   :  { %v684_v44 = vpop.f32.mrb[0].mxu0 }
 0x198   :  { %v685_v8 = vpop.f32.mrb[1].mxu0 }
 0x199   :  { %v686_v9 = vadd.f32 %v685_v8, %v684_v44 }
 0x19b   :  { %v537_v10 = vadd.f32 %v686_v9, %v466_v7 }
 0x19d   :  { %538 = vst [vmem:[#allocation4] sm:$0xf] %v537_v10 }
 0x19e   :  { %759 = shalt.err (!%p756_p12)
}
 0x19f   :  { %s760_s3 = scalar_lea.hbm %s1042_s4, 64 }
 0x1a0   :  { %p761_p13 = scmp.ne.s32.totalorder %s1042_s4, %s760_s3  ;;  %p764_p0 = scmp.lt.u32.totalorder %s760_s3, %s1042_s4 }
 0x1a2   :  { %p766_p1 = pnand %p764_p0, %p761_p13 }
 0x1a4   :  { %769 = shalt.err (!%p766_p1)
}
 0x1a5   :  { %561 = dma.vmem_to_hbm [thread:$0]  %s559_s0, 64, %s1042_s4, [#allocation5]  }
 0x1a6   :  { %770 = dma.done.wait [#allocation3], 128  }
 0x1a7   :  { %771 = vsyncadd [#allocation3], 4294967168 }
 0x1a8   :  { %772 = dma.done.wait [#allocation5], 64  }
 0x1a9   :  { %773 = vsyncadd [#allocation5], 4294967232 }
 0x1aa   :  { %568 = vsyncpa [#allocation3], 1 }
 0x1ab   :  { %569 = vsyncpa [#allocation5], 1 }

</bundles_post_ra>
